<compile_context>
chip_gen: v5e
topology: v5e:2x2
jax: 0.10.0
libtpu: 0.0.40
codegen_flags: <defaults>
</compile_context>

<pallas_src>
import jax
import jax.numpy as jnp
from jax.experimental import pallas as pl
from jax.experimental.pallas import tpu as pltpu

VOCAB_SIZE = 1024
HIDDEN = 128
EMBED = 64


def decoder_kernel(tok_ref,                 # (T, B) int32, SMEM (scalar prefetch)
                   attns_ref,               # (1, B, ENC) f32  per-step block
                   h0_ref, c0_ref,          # (B, H) f32       constant blocks
                   emb_ref,                 # (V, E) f32       VMEM-resident
                   w_ref,                   # (K_PAD, 4H) bf16 VMEM-resident
                   b_ref,                   # (1, 4H) f32
                   h_out_ref, c_out_ref,    # (B, H) f32
                   h_scr, c_scr):           # (B, H) f32 VMEM recurrent carry
    t = pl.program_id(0)

    @pl.when(t == 0)
    def _init():
        h_scr[...] = h0_ref[...]
        c_scr[...] = c0_ref[...]

    h = h_scr[...]
    c = c_scr[...]
    B, H = h.shape

    # --- embedding lookup: B dynamic row reads from the resident table ------
    # (no one-hot matmul, no HIGHEST-precision K=1024 MXU pass)
    rows = []
    for b in range(B):
        tok = tok_ref[t, b]                         # scalar read from SMEM
        rows.append(emb_ref[pl.ds(tok, 1), :])      # (1, EMBED)
    x = jnp.concatenate(rows, axis=0)               # (B, EMBED) f32

    attns = attns_ref[0]                            # (B, ENC) f32

    # --- pack [x | attns | h | 0-pad] to K_PAD and do ONE fused matmul ------
    k_pad = w_ref.shape[0]
    pad = k_pad - (x.shape[1] + attns.shape[1] + H)
    pieces = [x, attns, h]
    if pad:
        pieces.append(jnp.zeros((B, pad), jnp.float32))
    packed = jnp.concatenate(pieces, axis=-1)       # (B, K_PAD) f32

    gates = jnp.dot(packed.astype(jnp.bfloat16), w_ref[...],
                    preferred_element_type=jnp.float32) + b_ref[...]  # (B, 4H)

    # --- LSTMCell gate math, f32, lane-aligned 128-wide slices --------------
    i_g = jax.nn.sigmoid(gates[:, 0 * H:1 * H])
    f_g = jax.nn.sigmoid(gates[:, 1 * H:2 * H])
    g_g = jnp.tanh(gates[:, 2 * H:3 * H])
    o_g = jax.nn.sigmoid(gates[:, 3 * H:4 * H])

    c_new = f_g * c + i_g * g_g
    h_new = o_g * jnp.tanh(c_new)

    h_scr[...] = h_new
    c_scr[...] = c_new

    @pl.when(t == pl.num_programs(0) - 1)
    def _finalize():
        h_out_ref[...] = h_new
        c_out_ref[...] = c_new


def make_decoder_params(key, enc_size):
    """Parameter init mirroring nn.Embedding / nn.LSTMCell shapes,
    pre-fused / pre-transposed / zero-padded for the kernel."""
    k_emb, k_wih, k_whh, k_bih, k_bhh = jax.random.split(key, 5)
    input_size = EMBED + enc_size
    k_total = input_size + HIDDEN
    k_pad = ((k_total + 127) // 128) * 128          # pad K to MXU tile (256)
    bound = HIDDEN ** -0.5

    embedding = jax.random.normal(k_emb, (VOCAB_SIZE, EMBED), jnp.float32)
    embedding = embedding.at[0].set(0.0)            # padding_idx=0 row is zero

    w_ih = jax.random.uniform(k_wih, (4 * HIDDEN, input_size), jnp.float32,
                              -bound, bound)
    w_hh = jax.random.uniform(k_whh, (4 * HIDDEN, HIDDEN), jnp.float32,
                              -bound, bound)
    b_ih = jax.random.uniform(k_bih, (4 * HIDDEN,), jnp.float32, -bound, bound)
    b_hh = jax.random.uniform(k_bhh, (4 * HIDDEN,), jnp.float32, -bound, bound)

    # Fused weight rows ordered [x | attns | h | zero-pad], matching the
    # in-kernel packing.  Stored in bf16; matmul accumulates in f32.
    w_all = jnp.zeros((k_pad, 4 * HIDDEN), jnp.float32)
    w_all = w_all.at[:input_size, :].set(w_ih.T)
    w_all = w_all.at[input_size:k_total, :].set(w_hh.T)

    return {
        "embedding": embedding,                     # (V, EMBED) f32
        "w_all": w_all.astype(jnp.bfloat16),        # (K_PAD, 4H) bf16
        "bias": (b_ih + b_hh)[None, :],             # (1, 4H) f32
    }


def _decoder_pallas(params, tokens_tb, attns_tbe, h0, c0):
    T, B = tokens_tb.shape
    enc = attns_tbe.shape[-1]
    k_pad, four_h = params["w_all"].shape
    H = HIDDEN

    # Cost estimate (post-optimization: no one-hot gather, bf16 weight bytes).
    flops = 2 * T * B * k_pad * four_h
    transcendentals = 5 * T * B * H                 # 3 sigmoid + 2 tanh / step
    bytes_accessed = (VOCAB_SIZE * EMBED * 4        # f32 table (once)
                      + k_pad * four_h * 2          # bf16 fused weight (once)
                      + four_h * 4                  # bias
                      + T * B * (4 + enc * 4)       # tokens + attns per step
                      + 4 * B * H * 4)              # h0,c0 in + h,c out

    grid_spec = pltpu.PrefetchScalarGridSpec(
        num_scalar_prefetch=1,                      # tokens -> SMEM
        grid=(T,),
        in_specs=[
            pl.BlockSpec((1, B, enc), lambda t, tok: (t, 0, 0)),       # attns
            pl.BlockSpec((B, H), lambda t, tok: (0, 0)),               # h0
            pl.BlockSpec((B, H), lambda t, tok: (0, 0)),               # c0
            pl.BlockSpec((VOCAB_SIZE, EMBED), lambda t, tok: (0, 0)),  # table
            pl.BlockSpec((k_pad, four_h), lambda t, tok: (0, 0)),      # W_all
            pl.BlockSpec((1, four_h), lambda t, tok: (0, 0)),          # bias
        ],
        out_specs=[
            pl.BlockSpec((B, H), lambda t, tok: (0, 0)),
            pl.BlockSpec((B, H), lambda t, tok: (0, 0)),
        ],
        scratch_shapes=[pltpu.VMEM((B, H), jnp.float32),   # h carry
                        pltpu.VMEM((B, H), jnp.float32)],  # c carry
    )

    h_new, c_new = pl.pallas_call(
        decoder_kernel,
        out_shape=(jax.ShapeDtypeStruct((B, H), jnp.float32),
                   jax.ShapeDtypeStruct((B, H), jnp.float32)),
        grid_spec=grid_spec,
        compiler_params=pltpu.CompilerParams(
            dimension_semantics=("arbitrary",)),    # sequential recurrence over T
        cost_estimate=pl.CostEstimate(flops=int(flops),
                                      transcendentals=int(transcendentals),
                                      bytes_accessed=int(bytes_accessed)),
    )(tokens_tb, attns_tbe, h0, c0,
      params["embedding"], params["w_all"], params["bias"])
    return h_new, c_new


@jax.jit
def decoder_forward(params, tokens, attns, h, c):
    """Single LSTMCell step — same semantics as Decoder.forward (T == 1)."""
    return _decoder_pallas(params, tokens.astype(jnp.int32)[None, :],
                           attns[None, :, :], h, c)


@jax.jit
def decoder_decode(params, tokens_tb, attns_tbe, h0, c0):
    """T-step decode: the timestep loop runs inside ONE kernel launch."""
    return _decoder_pallas(params, tokens_tb.astype(jnp.int32), attns_tbe, h0, c0)


# ----------------------------- pure-JAX reference ---------------------------
def decoder_step_ref(params, tokens, attns, h, c):
    """Mirror of Decoder.forward using the same (bf16-stored) fused weights."""
    x = jnp.take(params["embedding"], tokens, axis=0)
    B = x.shape[0]
    k_pad = params["w_all"].shape[0]
    pad = k_pad - (x.shape[1] + attns.shape[1] + h.shape[1])
    pieces = [x, attns, h]
    if pad:
        pieces.append(jnp.zeros((B, pad), jnp.float32))
    packed = jnp.concatenate(pieces, axis=1)
    gates = jnp.dot(packed.astype(jnp.bfloat16), params["w_all"],
                    preferred_element_type=jnp.float32) + params["bias"]
    H = h.shape[1]
    i_g = jax.nn.sigmoid(gates[:, 0 * H:1 * H])
    f_g = jax.nn.sigmoid(gates[:, 1 * H:2 * H])
    g_g = jnp.tanh(gates[:, 2 * H:3 * H])
    o_g = jax.nn.sigmoid(gates[:, 3 * H:4 * H])
    c_new = f_g * c + i_g * g_g
    h_new = o_g * jnp.tanh(c_new)
    return h_new, c_new


def decoder_decode_ref(params, tokens_tb, attns_tbe, h, c):
    for t in range(tokens_tb.shape[0]):
        h, c = decoder_step_ref(params, tokens_tb[t], attns_tbe[t], h, c)
    return h, c


if __name__ == "__main__":
    B = 8          # batch (sublane-aligned)
    ENC_SIZE = 32  # encoder feature size
    T = 6          # decode steps for the fused multi-step path

    key = jax.random.PRNGKey(0)
    (k_params, k_tok, k_attn, k_h, k_c,
     k_seq_tok, k_seq_attn) = jax.random.split(key, 7)

    params = make_decoder_params(k_params, ENC_SIZE)

    # --- single-step forward (matches Decoder.forward) ----------------------
    tokens = jax.random.randint(k_tok, (B,), 0, VOCAB_SIZE, dtype=jnp.int32)
    attns = jax.random.normal(k_attn, (B, ENC_SIZE), jnp.float32)
    h0 = 0.1 * jax.random.normal(k_h, (B, HIDDEN), jnp.float32)
    c0 = 0.1 * jax.random.normal(k_c, (B, HIDDEN), jnp.float32)

    h1, c1 = decoder_forward(params, tokens, attns, h0, c0)
    jax.block_until_ready((h1, c1))
    h1_ref, c1_ref = decoder_step_ref(params, tokens, attns, h0, c0)
    assert jnp.allclose(h1, h1_ref, atol=5e-4, rtol=5e-4), "single-step h mismatch"
    assert jnp.allclose(c1, c1_ref, atol=5e-4, rtol=5e-4), "single-step c mismatch"

    # --- multi-step decode: params stay VMEM-resident across all T steps ----
    tok_seq = jax.random.randint(k_seq_tok, (T, B), 0, VOCAB_SIZE,
                                 dtype=jnp.int32)
    attn_seq = jax.random.normal(k_seq_attn, (T, B, ENC_SIZE), jnp.float32)
    hT, cT = decoder_decode(params, tok_seq, attn_seq, h0, c0)
    jax.block_until_ready((hT, cT))
    hT_ref, cT_ref = decoder_decode_ref(params, tok_seq, attn_seq, h0, c0)
    assert jnp.allclose(hT, hT_ref, atol=1e-3, rtol=1e-3), "multi-step h mismatch"
    assert jnp.allclose(cT, cT_ref, atol=1e-3, rtol=1e-3), "multi-step c mismatch"

    print("KERNEL_OK")
</pallas_src>

<mosaic_0001>
module attributes {stable_mosaic.version = 11 : i64} {
  func.func @decoder_kernel(%arg0: i32, %arg1: memref<1x8xi32, #tpu.memory_space<smem>>, %arg2: memref<1x8x32xf32, #tpu.memory_space<vmem>>, %arg3: memref<8x128xf32, #tpu.memory_space<vmem>>, %arg4: memref<8x128xf32, #tpu.memory_space<vmem>>, %arg5: memref<1024x64xf32, #tpu.memory_space<vmem>>, %arg6: memref<256x512xbf16, #tpu.memory_space<vmem>>, %arg7: memref<1x512xf32, #tpu.memory_space<vmem>>, %arg8: memref<8x128xf32, #tpu.memory_space<vmem>>, %arg9: memref<8x128xf32, #tpu.memory_space<vmem>>, %arg10: memref<8x128xf32, #tpu.memory_space<vmem>>, %arg11: memref<8x128xf32, #tpu.memory_space<vmem>>) attributes {dimension_semantics = [#tpu.dimension_semantics<arbitrary>], iteration_bounds = array<i64: 1>, scalar_prefetch = 1 : i64, scratch_operands = 2 : i64, tpu.core_type = #tpu.core_type<tc>, window_params = [{transform_indices = @transform_0, window_bounds = array<i64: 1, 8, 32>}, {pipeline_mode = #tpu.pipeline_mode<synchronous>, transform_indices = @transform_1, window_bounds = array<i64: 8, 128>}, {pipeline_mode = #tpu.pipeline_mode<synchronous>, transform_indices = @transform_2, window_bounds = array<i64: 8, 128>}, {pipeline_mode = #tpu.pipeline_mode<synchronous>, transform_indices = @transform_3, window_bounds = array<i64: 1024, 64>}, {pipeline_mode = #tpu.pipeline_mode<synchronous>, transform_indices = @transform_4, window_bounds = array<i64: 256, 512>}, {pipeline_mode = #tpu.pipeline_mode<synchronous>, transform_indices = @transform_5, window_bounds = array<i64: 1, 512>}, {pipeline_mode = #tpu.pipeline_mode<synchronous>, transform_indices = @transform_6, window_bounds = array<i64: 8, 128>}, {pipeline_mode = #tpu.pipeline_mode<synchronous>, transform_indices = @transform_7, window_bounds = array<i64: 8, 128>}]} {
    %c0_i32 = arith.constant 0 : i32
    %0 = arith.cmpi eq, %arg0, %c0_i32 : i32
    %1 = arith.extui %0 : i1 to i32
    %c0_i32_0 = arith.constant 0 : i32
    %2 = arith.cmpi ne, %1, %c0_i32_0 : i32
    scf.if %2 {
      %c0_30 = arith.constant 0 : index
      %c0_31 = arith.constant 0 : index
      %78 = vector.load %arg3[%c0_30, %c0_31] : memref<8x128xf32, #tpu.memory_space<vmem>>, vector<8x128xf32>
      %c0_32 = arith.constant 0 : index
      %c0_33 = arith.constant 0 : index
      %79 = vector.load %arg10[%c0_32, %c0_33] : memref<8x128xf32, #tpu.memory_space<vmem>>, vector<8x128xf32>
      tpu.vector_store %arg10[%c0_32, %c0_33], %78 {strides = array<i32>} : memref<8x128xf32, #tpu.memory_space<vmem>>, vector<8x128xf32>,
      %c0_34 = arith.constant 0 : index
      %c0_35 = arith.constant 0 : index
      %80 = vector.load %arg4[%c0_34, %c0_35] : memref<8x128xf32, #tpu.memory_space<vmem>>, vector<8x128xf32>
      %c0_36 = arith.constant 0 : index
      %c0_37 = arith.constant 0 : index
      %81 = vector.load %arg11[%c0_36, %c0_37] : memref<8x128xf32, #tpu.memory_space<vmem>>, vector<8x128xf32>
      tpu.vector_store %arg11[%c0_36, %c0_37], %80 {strides = array<i32>} : memref<8x128xf32, #tpu.memory_space<vmem>>, vector<8x128xf32>,
    } else {
    }
    %c0 = arith.constant 0 : index
    %c0_1 = arith.constant 0 : index
    %3 = vector.load %arg10[%c0, %c0_1] : memref<8x128xf32, #tpu.memory_space<vmem>>, vector<8x128xf32>
    %c0_2 = arith.constant 0 : index
    %c0_3 = arith.constant 0 : index
    %4 = vector.load %arg11[%c0_2, %c0_3] : memref<8x128xf32, #tpu.memory_space<vmem>>, vector<8x128xf32>
    %5 = arith.index_cast %arg0 : i32 to index
    %c0_4 = arith.constant 0 : index
    %6 = memref.load %arg1[%5, %c0_4] : memref<1x8xi32, #tpu.memory_space<smem>>
    %7 = arith.index_cast %6 : i32 to index
    %c0_5 = arith.constant 0 : index
    %8 = vector.load %arg5[%7, %c0_5] : memref<1024x64xf32, #tpu.memory_space<vmem>>, vector<1x64xf32>
    %9 = arith.index_cast %arg0 : i32 to index
    %c1 = arith.constant 1 : index
    %10 = memref.load %arg1[%9, %c1] : memref<1x8xi32, #tpu.memory_space<smem>>
    %11 = arith.index_cast %10 : i32 to index
    %c0_6 = arith.constant 0 : index
    %12 = vector.load %arg5[%11, %c0_6] : memref<1024x64xf32, #tpu.memory_space<vmem>>, vector<1x64xf32>
    %13 = arith.index_cast %arg0 : i32 to index
    %c2 = arith.constant 2 : index
    %14 = memref.load %arg1[%13, %c2] : memref<1x8xi32, #tpu.memory_space<smem>>
    %15 = arith.index_cast %14 : i32 to index
    %c0_7 = arith.constant 0 : index
    %16 = vector.load %arg5[%15, %c0_7] : memref<1024x64xf32, #tpu.memory_space<vmem>>, vector<1x64xf32>
    %17 = arith.index_cast %arg0 : i32 to index
    %c3 = arith.constant 3 : index
    %18 = memref.load %arg1[%17, %c3] : memref<1x8xi32, #tpu.memory_space<smem>>
    %19 = arith.index_cast %18 : i32 to index
    %c0_8 = arith.constant 0 : index
    %20 = vector.load %arg5[%19, %c0_8] : memref<1024x64xf32, #tpu.memory_space<vmem>>, vector<1x64xf32>
    %21 = arith.index_cast %arg0 : i32 to index
    %c4 = arith.constant 4 : index
    %22 = memref.load %arg1[%21, %c4] : memref<1x8xi32, #tpu.memory_space<smem>>
    %23 = arith.index_cast %22 : i32 to index
    %c0_9 = arith.constant 0 : index
    %24 = vector.load %arg5[%23, %c0_9] : memref<1024x64xf32, #tpu.memory_space<vmem>>, vector<1x64xf32>
    %25 = arith.index_cast %arg0 : i32 to index
    %c5 = arith.constant 5 : index
    %26 = memref.load %arg1[%25, %c5] : memref<1x8xi32, #tpu.memory_space<smem>>
    %27 = arith.index_cast %26 : i32 to index
    %c0_10 = arith.constant 0 : index
    %28 = vector.load %arg5[%27, %c0_10] : memref<1024x64xf32, #tpu.memory_space<vmem>>, vector<1x64xf32>
    %29 = arith.index_cast %arg0 : i32 to index
    %c6 = arith.constant 6 : index
    %30 = memref.load %arg1[%29, %c6] : memref<1x8xi32, #tpu.memory_space<smem>>
    %31 = arith.index_cast %30 : i32 to index
    %c0_11 = arith.constant 0 : index
    %32 = vector.load %arg5[%31, %c0_11] : memref<1024x64xf32, #tpu.memory_space<vmem>>, vector<1x64xf32>
    %33 = arith.index_cast %arg0 : i32 to index
    %c7 = arith.constant 7 : index
    %34 = memref.load %arg1[%33, %c7] : memref<1x8xi32, #tpu.memory_space<smem>>
    %35 = arith.index_cast %34 : i32 to index
    %c0_12 = arith.constant 0 : index
    %36 = vector.load %arg5[%35, %c0_12] : memref<1024x64xf32, #tpu.memory_space<vmem>>, vector<1x64xf32>
    %37 = tpu.concatenate %8, %12, %16, %20, %24, %28, %32, %36 in 0 : vector<1x64xf32>, vector<1x64xf32>, vector<1x64xf32>, vector<1x64xf32>, vector<1x64xf32>, vector<1x64xf32>, vector<1x64xf32>, vector<1x64xf32> -> vector<8x64xf32>
    %c0_13 = arith.constant 0 : index
    %c0_14 = arith.constant 0 : index
    %c0_15 = arith.constant 0 : index
    %38 = vector.load %arg2[%c0_13, %c0_14, %c0_15] : memref<1x8x32xf32, #tpu.memory_space<vmem>>, vector<1x8x32xf32>
    %39 = vector.shape_cast %38 : vector<1x8x32xf32> to vector<8x32xf32>
    %cst = arith.constant 0.000000e+00 : f32
    %40 = vector.broadcast %cst : f32 to vector<8x32xf32>
    %41 = tpu.concatenate %37, %39, %3, %40 in 1 : vector<8x64xf32>, vector<8x32xf32>, vector<8x128xf32>, vector<8x32xf32> -> vector<8x256xf32>
    %42 = arith.truncf %41 : vector<8x256xf32> to vector<8x256xbf16>
    %c0_16 = arith.constant 0 : index
    %c0_17 = arith.constant 0 : index
    %43 = vector.load %arg6[%c0_16, %c0_17] : memref<256x512xbf16, #tpu.memory_space<vmem>>, vector<256x512xbf16>
    %cst_18 = arith.constant dense<0.000000e+00> : vector<8x512xf32>
    %44 = tpu.matmul %42, %43, %cst_18 {dimension_numbers = #tpu.dot_dimension_numbers<[1], [0], [0], [1], [0, 0, 1, 1], [], []>} : vector<8x256xbf16>, vector<256x512xbf16>, vector<8x512xf32> -> vector<8x512xf32>
    %c0_19 = arith.constant 0 : index
    %c0_20 = arith.constant 0 : index
    %45 = vector.load %arg7[%c0_19, %c0_20] : memref<1x512xf32, #tpu.memory_space<vmem>>, vector<1x512xf32>
    %46 = vector.broadcast %45 : vector<1x512xf32> to vector<8x512xf32>
    %47 = arith.addf %44, %46 : vector<8x512xf32>
    %48 = vector.extract_strided_slice %47 {offsets = [0, 0], sizes = [8, 128], strides = [1, 1]} : vector<8x512xf32> to vector<8x128xf32>
    %49 = arith.negf %48 : vector<8x128xf32>
    %50 = math.exp %49 : vector<8x128xf32>
    %cst_21 = arith.constant 1.000000e+00 : f32
    %51 = vector.broadcast %cst_21 : f32 to vector<8x128xf32>
    %52 = arith.addf %51, %50 : vector<8x128xf32>
    %53 = arith.divf %51, %52 : vector<8x128xf32>
    %54 = vector.extract_strided_slice %47 {offsets = [0, 128], sizes = [8, 128], strides = [1, 1]} : vector<8x512xf32> to vector<8x128xf32>
    %55 = arith.negf %54 : vector<8x128xf32>
    %56 = math.exp %55 : vector<8x128xf32>
    %cst_22 = arith.constant 1.000000e+00 : f32
    %57 = vector.broadcast %cst_22 : f32 to vector<8x128xf32>
    %58 = arith.addf %57, %56 : vector<8x128xf32>
    %59 = arith.divf %57, %58 : vector<8x128xf32>
    %60 = vector.extract_strided_slice %47 {offsets = [0, 256], sizes = [8, 128], strides = [1, 1]} : vector<8x512xf32> to vector<8x128xf32>
    %61 = math.tanh %60 : vector<8x128xf32>
    %62 = vector.extract_strided_slice %47 {offsets = [0, 384], sizes = [8, 128], strides = [1, 1]} : vector<8x512xf32> to vector<8x128xf32>
    %63 = arith.negf %62 : vector<8x128xf32>
    %64 = math.exp %63 : vector<8x128xf32>
    %cst_23 = arith.constant 1.000000e+00 : f32
    %65 = vector.broadcast %cst_23 : f32 to vector<8x128xf32>
    %66 = arith.addf %65, %64 : vector<8x128xf32>
    %67 = arith.divf %65, %66 : vector<8x128xf32>
    %68 = arith.mulf %59, %4 : vector<8x128xf32>
    %69 = arith.mulf %53, %61 : vector<8x128xf32>
    %70 = arith.addf %68, %69 : vector<8x128xf32>
    %71 = math.tanh %70 : vector<8x128xf32>
    %72 = arith.mulf %67, %71 : vector<8x128xf32>
    %c0_24 = arith.constant 0 : index
    %c0_25 = arith.constant 0 : index
    %73 = vector.load %arg10[%c0_24, %c0_25] : memref<8x128xf32, #tpu.memory_space<vmem>>, vector<8x128xf32>
    tpu.vector_store %arg10[%c0_24, %c0_25], %72 {strides = array<i32>} : memref<8x128xf32, #tpu.memory_space<vmem>>, vector<8x128xf32>,
    %c0_26 = arith.constant 0 : index
    %c0_27 = arith.constant 0 : index
    %74 = vector.load %arg11[%c0_26, %c0_27] : memref<8x128xf32, #tpu.memory_space<vmem>>, vector<8x128xf32>
    tpu.vector_store %arg11[%c0_26, %c0_27], %70 {strides = array<i32>} : memref<8x128xf32, #tpu.memory_space<vmem>>, vector<8x128xf32>,
    %c0_i32_28 = arith.constant 0 : i32
    %75 = arith.cmpi eq, %arg0, %c0_i32_28 : i32
    %76 = arith.extui %75 : i1 to i32
    %c0_i32_29 = arith.constant 0 : i32
    %77 = arith.cmpi ne, %76, %c0_i32_29 : i32
    scf.if %77 {
      %c0_30 = arith.constant 0 : index
      %c0_31 = arith.constant 0 : index
      %78 = vector.load %arg8[%c0_30, %c0_31] : memref<8x128xf32, #tpu.memory_space<vmem>>, vector<8x128xf32>
      tpu.vector_store %arg8[%c0_30, %c0_31], %72 {strides = array<i32>} : memref<8x128xf32, #tpu.memory_space<vmem>>, vector<8x128xf32>,
      %c0_32 = arith.constant 0 : index
      %c0_33 = arith.constant 0 : index
      %79 = vector.load %arg9[%c0_32, %c0_33] : memref<8x128xf32, #tpu.memory_space<vmem>>, vector<8x128xf32>
      tpu.vector_store %arg9[%c0_32, %c0_33], %70 {strides = array<i32>} : memref<8x128xf32, #tpu.memory_space<vmem>>, vector<8x128xf32>,
    } else {
    }
    return
  }
  func.func @transform_0(%arg0: i32, %arg1: memref<1x8xi32, #tpu.memory_space<smem>>) -> (i32, i32, i32) {
    %c0_i32 = arith.constant 0 : i32
    %c0_i32_0 = arith.constant 0 : i32
    %c0_i32_1 = arith.constant 0 : i32
    return %arg0, %c0_i32, %c0_i32_0 : i32, i32, i32
  }
  func.func @transform_1(%arg0: i32, %arg1: memref<1x8xi32, #tpu.memory_space<smem>>) -> (i32, i32) {
    %c0_i32 = arith.constant 0 : i32
    %c0_i32_0 = arith.constant 0 : i32
    %c0_i32_1 = arith.constant 0 : i32
    return %c0_i32, %c0_i32_0 : i32, i32
  }
  func.func @transform_2(%arg0: i32, %arg1: memref<1x8xi32, #tpu.memory_space<smem>>) -> (i32, i32) {
    %c0_i32 = arith.constant 0 : i32
    %c0_i32_0 = arith.constant 0 : i32
    %c0_i32_1 = arith.constant 0 : i32
    return %c0_i32, %c0_i32_0 : i32, i32
  }
  func.func @transform_3(%arg0: i32, %arg1: memref<1x8xi32, #tpu.memory_space<smem>>) -> (i32, i32) {
    %c0_i32 = arith.constant 0 : i32
    %c0_i32_0 = arith.constant 0 : i32
    %c0_i32_1 = arith.constant 0 : i32
    return %c0_i32, %c0_i32_0 : i32, i32
  }
  func.func @transform_4(%arg0: i32, %arg1: memref<1x8xi32, #tpu.memory_space<smem>>) -> (i32, i32) {
    %c0_i32 = arith.constant 0 : i32
    %c0_i32_0 = arith.constant 0 : i32
    %c0_i32_1 = arith.constant 0 : i32
    return %c0_i32, %c0_i32_0 : i32, i32
  }
  func.func @transform_5(%arg0: i32, %arg1: memref<1x8xi32, #tpu.memory_space<smem>>) -> (i32, i32) {
    %c0_i32 = arith.constant 0 : i32
    %c0_i32_0 = arith.constant 0 : i32
    %c0_i32_1 = arith.constant 0 : i32
    return %c0_i32, %c0_i32_0 : i32, i32
  }
  func.func @transform_6(%arg0: i32, %arg1: memref<1x8xi32, #tpu.memory_space<smem>>) -> (i32, i32) {
    %c0_i32 = arith.constant 0 : i32
    %c0_i32_0 = arith.constant 0 : i32
    %c0_i32_1 = arith.constant 0 : i32
    return %c0_i32, %c0_i32_0 : i32, i32
  }
  func.func @transform_7(%arg0: i32, %arg1: memref<1x8xi32, #tpu.memory_space<smem>>) -> (i32, i32) {
    %c0_i32 = arith.constant 0 : i32
    %c0_i32_0 = arith.constant 0 : i32
    %c0_i32_1 = arith.constant 0 : i32
    return %c0_i32, %c0_i32_0 : i32, i32
  }
}

</mosaic_0001>

<bundles_post_ra>
// kernel: decoder_forward.1
= control target key start
LH: loop header
LB: loop body
LE: loop exit
PB: predicated region body
PF: predicated region fallthrough
CT: control target
= control target key end

     0   :  { %s1166_s30 = smov [#allocation5]   ;;  %s1681_s0 = inlined_call_operand.vmem [shape: s32[1,8], index: 0, kind: input, shape index: {}]   ;;  %s1682_s1 = inlined_call_operand.vmem [shape: f32[1,8,32], index: 1, kind: input, shape index: {}]   ;;  %s1683_s2 = inlined_call_operand.vmem [shape: f32[8,128], index: 2, kind: input, shape index: {}]   ;;  %s1684_s3 = inlined_call_operand.vmem [shape: f32[8,128], index: 3, kind: input, shape index: {}]   ;;  %s1685_s4 = inlined_call_operand.vmem [shape: f32[1024,64], index: 4, kind: input, shape index: {}]   ;;  %s1686_s5 = inlined_call_operand.vmem [shape: bf16[256,512], index: 5, kind: input, shape index: {}]   ;;  %s1687_s6 = inlined_call_operand.vmem [shape: f32[1,512], index: 6, kind: input, shape index: {}]   ;;  %s1688_s7 = inlined_call_operand.hbm [shape: f32[8,128], index: 7, kind: output, shape index: {0}]   ;;  %s1689_s8 = inlined_call_operand.hbm [shape: f32[8,128], index: 8, kind: output, shape index: {1}]  }
   0x1   :  { %s15_s29 = sshll.u32 %s1681_s0, 4  ;;  %s16_s29 = int_to_ptr.vmem [resolvable:$true] %s15_s29 }
   0x2   :  { %18 = dma.vmem_to_smem %s16_s29, 16, %s1166_s30, [#allocation4] }
   0x3   :  { %1160 = dma.done.wait [#allocation4], 16 }
   0x4   :  { %1161 = vsyncadd [#allocation4], 4294967280 }
   0x5   :  { %21 = sfence }
   0x6   :  { %22 = vsyncpa [#allocation7], 0  ;;  %v113_v0 = vld [vmem:[%s1682_s1] sm:$0xff]  ;;  %s1167_s13 = smov 64   ;;  %v1077_v2 = vld [vmem:[%s1686_s5 + $0x1ec] sm:$0xf0] }
   0x7   :  { %v986_v1 = vld [vmem:[%s1686_s5 + $0x1e0] sm:$0xf]  ;;  %115 = vrot.lane.b32.xlu0 %v113_v0, %s1167_s13  ;;  %v1075_v3 = vld [vmem:[%s1686_s5 + $0x1e4] sm:$0xf]  ;;  %v988_v4 = vld [vmem:[%s1686_s5 + $0x1f0] sm:$0xf0] }
   0x8   :  { %v987_v5 = vor.u32 %v1077_v2, %v986_v1  ;;  %v991_v6 = vor.u32 %v1075_v3, %v988_v4  ;;  %v858_v7 = vld [vmem:[%s1686_s5 + $0xe0] sm:$0xf]  ;;  %v1045_v8 = vld [vmem:[%s1686_s5 + $0xec] sm:$0xf0]  ;;  %v1043_v9 = vld [vmem:[%s1686_s5 + $0xe4] sm:$0xf] }
   0x9   :  { %v859_v10 = vor.u32 %v1045_v8, %v858_v7  ;;  %v860_v11 = vld [vmem:[%s1686_s5 + $0xf0] sm:$0xf0]  ;;  %v970_v12 = vld [vmem:[%s1686_s5 + $0x1c0] sm:$0xf]  ;;  %v1073_v13 = vld [vmem:[%s1686_s5 + $0x1cc] sm:$0xf0] }
   0xa   :  { %v40_v14 = vld [vmem:[%s1683_s2] sm:$0xff]  ;;  %536 = vmatpush.bf16.msra.mxu1 %v987_v5  ;;  %562 = vmatpush.bf16.msra.mxu3 %v991_v6  ;;  %v863_v15 = vor.u32 %v1043_v9, %v860_v11  ;;  %v971_v16 = vor.u32 %v1073_v13, %v970_v12  ;;  %v972_v18 = vld [vmem:[%s1686_s5 + $0x1d0] sm:$0xf0]  ;;  %v1041_v21 = vld [vmem:[%s1686_s5 + $0xcc] sm:$0xf0]  ;;  %s1168_s15 = smov 96  }
   0xb   :  { %v1071_v17 = vld [vmem:[%s1686_s5 + $0x1c4] sm:$0xf]  ;;  %v842_v19 = vld [vmem:[%s1686_s5 + $0xc0] sm:$0xf]  ;;  %523 = vmatpush.bf16.msra.mxu0 %v859_v10  ;;  %v844_v23 = vld [vmem:[%s1686_s5 + $0xd0] sm:$0xf0] }
   0xc   :  { %v975_v20 = vor.u32 %v1071_v17, %v972_v18  ;;  %v1039_v22 = vld [vmem:[%s1686_s5 + $0xc4] sm:$0xf]  ;;  %549 = vmatpush.bf16.msra.mxu2 %v863_v15  ;;  %v843_v24 = vor.u32 %v1041_v21, %v842_v19  ;;  %v954_v26 = vld [vmem:[%s1686_s5 + $0x1a0] sm:$0xf]  ;;  %v1069_v27 = vld [vmem:[%s1686_s5 + $0x1ac] sm:$0xf0] }
   0xd   :  { %v847_v25 = vor.u32 %v1039_v22, %v844_v23  ;;  %v1067_v28 = vld [vmem:[%s1686_s5 + $0x1a4] sm:$0xf]  ;;  %v956_v29 = vld [vmem:[%s1686_s5 + $0x1b0] sm:$0xf0]  ;;  %v826_v30 = vld [vmem:[%s1686_s5 + $0xa0] sm:$0xf]  ;;  %v955_v32 = vor.u32 %v1069_v27, %v954_v26 }
   0xe   :  { %v1037_v31 = vld [vmem:[%s1686_s5 + $0xac] sm:$0xf0]  ;;  %537 = vmatpush.bf16.msra.mxu1 %v971_v16  ;;  %563 = vmatpush.bf16.msra.mxu3 %v975_v20  ;;  %v959_v33 = vor.u32 %v1067_v28, %v956_v29  ;;  %v1035_v34 = vld [vmem:[%s1686_s5 + $0xa4] sm:$0xf]  ;;  %v828_v35 = vld [vmem:[%s1686_s5 + $0xb0] sm:$0xf0] }
   0xf   :  { %v938_v36 = vld [vmem:[%s1686_s5 + $0x180] sm:$0xf]  ;;  %119 = vrot.lane.b32.xlu0 %v40_v14, %s1168_s15  ;;  %524 = vmatpush.bf16.msra.mxu0 %v843_v24  ;;  %v827_v37 = vor.u32 %v1037_v31, %v826_v30  ;;  %v1065_v38 = vld [vmem:[%s1686_s5 + $0x18c] sm:$0xf0]  ;;  %v1063_v39 = vld [vmem:[%s1686_s5 + $0x184] sm:$0xf]  ;;  %v831_v41 = vor.u32 %v1035_v34, %v828_v35 }
  0x10   :  { %v940_v40 = vld [vmem:[%s1686_s5 + $0x190] sm:$0xf0]  ;;  %550 = vmatpush.bf16.msra.mxu2 %v847_v25  ;;  %v810_v42 = vld [vmem:[%s1686_s5 + $0x80] sm:$0xf]  ;;  %v1033_v43 = vld [vmem:[%s1686_s5 + $0x8c] sm:$0xf0]  ;;  %v939_v46 = vor.u32 %v1065_v38, %v938_v36 }
  0x11   :  { %v1031_v44 = vld [vmem:[%s1686_s5 + $0x84] sm:$0xf]  ;;  %v812_v45 = vld [vmem:[%s1686_s5 + $0x90] sm:$0xf0]  ;;  %v943_v47 = vor.u32 %v1063_v39, %v940_v40  ;;  %v922_v48 = vld [vmem:[%s1686_s5 + $0x160] sm:$0xf]  ;;  %v811_v49 = vor.u32 %v1033_v43, %v810_v42 }
  0x12   :  { %538 = vmatpush.bf16.msra.mxu1 %v955_v32  ;;  %564 = vmatpush.bf16.msra.mxu3 %v959_v33  ;;  %v1061_v50 = vld [vmem:[%s1686_s5 + $0x16c] sm:$0xf0]  ;;  %v1059_v51 = vld [vmem:[%s1686_s5 + $0x164] sm:$0xf]  ;;  %v924_v52 = vld [vmem:[%s1686_s5 + $0x170] sm:$0xf0]  ;;  %v815_v53 = vor.u32 %v1031_v44, %v812_v45 }
  0x13   :  { %525 = vmatpush.bf16.msra.mxu0 %v827_v37  ;;  %v794_v54 = vld [vmem:[%s1686_s5 + $0x60] sm:$0xf]  ;;  %v1029_v55 = vld [vmem:[%s1686_s5 + $0x6c] sm:$0xf0]  ;;  %v1027_v56 = vld [vmem:[%s1686_s5 + $0x64] sm:$0xf]  ;;  %v923_v58 = vor.u32 %v1061_v50, %v922_v48  ;;  %v927_v59 = vor.u32 %v1059_v51, %v924_v52 }
  0x14   :  { %551 = vmatpush.bf16.msra.mxu2 %v831_v41  ;;  %v796_v57 = vld [vmem:[%s1686_s5 + $0x70] sm:$0xf0]  ;;  %v906_v60 = vld [vmem:[%s1686_s5 + $0x140] sm:$0xf]  ;;  %v795_v61 = vor.u32 %v1029_v55, %v794_v54  ;;  %v1057_v62 = vld [vmem:[%s1686_s5 + $0x14c] sm:$0xf0] }
  0x15   :  { %v1055_v63 = vld [vmem:[%s1686_s5 + $0x144] sm:$0xf]  ;;  %v908_v0 = vld [vmem:[%s1686_s5 + $0x150] sm:$0xf0]  ;;  %v799_v1 = vor.u32 %v1027_v56, %v796_v57  ;;  %v778_v2 = vld [vmem:[%s1686_s5 + $0x40] sm:$0xf]  ;;  %v907_v6 = vor.u32 %v1057_v62, %v906_v60 }
  0x16   :  { %539 = vmatpush.bf16.msra.mxu1 %v939_v46  ;;  %565 = vmatpush.bf16.msra.mxu3 %v943_v47  ;;  %v1025_v3 = vld [vmem:[%s1686_s5 + $0x4c] sm:$0xf0]  ;;  %v1023_v4 = vld [vmem:[%s1686_s5 + $0x44] sm:$0xf]  ;;  %v780_v5 = vld [vmem:[%s1686_s5 + $0x50] sm:$0xf0]  ;;  %v911_v7 = vor.u32 %v1055_v63, %v908_v0 }
  0x17   :  { %526 = vmatpush.bf16.msra.mxu0 %v811_v49  ;;  %v890_v8 = vld [vmem:[%s1686_s5 + $0x120] sm:$0xf]  ;;  %v779_v9 = vor.u32 %v1025_v3, %v778_v2  ;;  %v1053_v10 = vld [vmem:[%s1686_s5 + $0x12c] sm:$0xf0]  ;;  %v1051_v11 = vld [vmem:[%s1686_s5 + $0x124] sm:$0xf]  ;;  %v783_v13 = vor.u32 %v1023_v4, %v780_v5 }
  0x18   :  { %552 = vmatpush.bf16.msra.mxu2 %v815_v53  ;;  %v892_v12 = vld [vmem:[%s1686_s5 + $0x130] sm:$0xf0]  ;;  %v762_v14 = vld [vmem:[%s1686_s5 + $0x20] sm:$0xf]  ;;  %v1021_v15 = vld [vmem:[%s1686_s5 + $0x2c] sm:$0xf0]  ;;  %v891_v20 = vor.u32 %v1053_v10, %v890_v8 }
  0x19   :  { %v1019_v16 = vld [vmem:[%s1686_s5 + $0x24] sm:$0xf]  ;;  %v764_v17 = vld [vmem:[%s1686_s5 + $0x30] sm:$0xf0]  ;;  %v874_v18 = vld [vmem:[%s1686_s5 + $0x100] sm:$0xf]  ;;  %v895_v21 = vor.u32 %v1051_v11, %v892_v12  ;;  %v763_v25 = vor.u32 %v1021_v15, %v762_v14 }
  0x1a   :  { %540 = vmatpush.bf16.msra.mxu1 %v923_v58  ;;  %566 = vmatpush.bf16.msra.mxu3 %v927_v59  ;;  %v1049_v19 = vld [vmem:[%s1686_s5 + $0x10c] sm:$0xf0]  ;;  %v1047_v22 = vld [vmem:[%s1686_s5 + $0x104] sm:$0xf]  ;;  %v876_v23 = vld [vmem:[%s1686_s5 + $0x110] sm:$0xf0]  ;;  %v767_v29 = vor.u32 %v1019_v16, %v764_v17 }
  0x1b   :  { %527 = vmatpush.bf16.msra.mxu0 %v795_v61  ;;  %v746_v24 = vld [vmem:[%s1686_s5] sm:$0xf]  ;;  %v1017_v26 = vld [vmem:[%s1686_s5 + $0xc] sm:$0xf0]  ;;  %v1015_v27 = vld [vmem:[%s1686_s5 + $0x4] sm:$0xf] }
  0x1c   :  { %553 = vmatpush.bf16.msra.mxu2 %v799_v1  ;;  %v748_v28 = vld [vmem:[%s1686_s5 + $0x10] sm:$0xf0]  ;;  %v994_v30 = vld [vmem:[%s1686_s5 + $0x1e8] sm:$0xf]  ;;  %v1078_v31 = vld [vmem:[%s1686_s5 + $0x1f4] sm:$0xf0] }
  0x1e   :  { %541 = vmatpush.bf16.msra.mxu1 %v907_v6  ;;  %567 = vmatpush.bf16.msra.mxu3 %v911_v7 }
  0x1f   :  { %528 = vmatpush.bf16.msra.mxu0 %v779_v9 }
  0x20   :  { %554 = vmatpush.bf16.msra.mxu2 %v783_v13 }
  0x21   :  { %23 = vsyncpa [#allocation9], 0  ;;  %v1076_v32 = vld [vmem:[%s1686_s5 + $0x1ec] sm:$0xf]  ;;  %v996_v33 = vld [vmem:[%s1686_s5 + $0x1f8] sm:$0xf0]  ;;  %v875_v35 = vor.u32 %v1049_v19, %v874_v18  ;;  %v879_v36 = vor.u32 %v1047_v22, %v876_v23  ;;  %v747_v40 = vor.u32 %v1017_v26, %v746_v24  ;;  %v995_v41 = vor.u32 %v1078_v31, %v994_v30 }
  0x22   :  { %v866_v34 = vld [vmem:[%s1686_s5 + $0xe8] sm:$0xf]  ;;  %542 = vmatpush.bf16.msra.mxu1 %v891_v20  ;;  %568 = vmatpush.bf16.msra.mxu3 %v895_v21  ;;  %v1046_v37 = vld [vmem:[%s1686_s5 + $0xf4] sm:$0xf0]  ;;  %v1044_v38 = vld [vmem:[%s1686_s5 + $0xec] sm:$0xf]  ;;  %v751_v42 = vor.u32 %v1015_v27, %v748_v28  ;;  %v999_v43 = vor.u32 %v1076_v32, %v996_v33 }
  0x23   :  { %v868_v39 = vld [vmem:[%s1686_s5 + $0xf8] sm:$0xf0]  ;;  %529 = vmatpush.bf16.msra.mxu0 %v763_v25  ;;  %v978_v44 = vld [vmem:[%s1686_s5 + $0x1c8] sm:$0xf]  ;;  %v1074_v45 = vld [vmem:[%s1686_s5 + $0x1d4] sm:$0xf0]  ;;  %v867_v46 = vor.u32 %v1046_v37, %v866_v34 }
  0x24   :  { %555 = vmatpush.bf16.msra.mxu2 %v767_v29  ;;  %v871_v47 = vor.u32 %v1044_v38, %v868_v39  ;;  %v1072_v48 = vld [vmem:[%s1686_s5 + $0x1cc] sm:$0xf]  ;;  %v980_v49 = vld [vmem:[%s1686_s5 + $0x1d8] sm:$0xf0]  ;;  %v979_v50 = vor.u32 %v1074_v45, %v978_v44  ;;  %s1453_s16 = sld [smem:[#allocation5 + $0x1]]  ;;  %vm99_vm0 = vcmask 1040384  }
  0x25   :  { %v983_v51 = vor.u32 %v1072_v48, %v980_v49  ;;  %s1455_s17 = sld [smem:[#allocation5 + $0x2]]  ;;  %v850_v52 = vld [vmem:[%s1686_s5 + $0xc8] sm:$0xf]  ;;  %v1042_v53 = vld [vmem:[%s1686_s5 + $0xd4] sm:$0xf0]  ;;  %vm101_vm1 = vcmask 1041408  }
  0x26   :  { %543 = vmatpush.bf16.msra.mxu1 %v875_v35  ;;  %569 = vmatpush.bf16.msra.mxu3 %v879_v36  ;;  %s1457_s18 = sld [smem:[#allocation5]]  ;;  %v851_v54 = vor.u32 %v1042_v53, %v850_v52  ;;  %v1040_v55 = vld [vmem:[%s1686_s5 + $0xcc] sm:$0xf]  ;;  %v852_v56 = vld [vmem:[%s1686_s5 + $0xd8] sm:$0xf0]  ;;  %vm103_vm2 = vcmask 1042432  }
  0x27   :  { %530 = vmatpush.bf16.msra.mxu0 %v747_v40  ;;  %s1465_s22 = sld [smem:[#allocation5 + $0x3]]  ;;  %v855_v57 = vor.u32 %v1040_v55, %v852_v56  ;;  %v962_v58 = vld [vmem:[%s1686_s5 + $0x1a8] sm:$0xf]  ;;  %v1070_v59 = vld [vmem:[%s1686_s5 + $0x1b4] sm:$0xf0]  ;;  %vm105_vm3 = vcmask 1043456  }
  0x28   :  { %556 = vmatpush.bf16.msra.mxu2 %v751_v42  ;;  %s1473_s27 = sld [smem:[#allocation5 + $0x4]]  ;;  %v1068_v60 = vld [vmem:[%s1686_s5 + $0x1ac] sm:$0xf]  ;;  %v963_v61 = vor.u32 %v1070_v59, %v962_v58  ;;  %v964_v62 = vld [vmem:[%s1686_s5 + $0x1b8] sm:$0xf0]  ;;  %vm107_vm4 = vcmask 1044480  }
  0x29   :  { %v834_v63 = vld [vmem:[%s1686_s5 + $0xa8] sm:$0xf]  ;;  %v1038_v0 = vld [vmem:[%s1686_s5 + $0xb4] sm:$0xf0]  ;;  %v967_v1 = vor.u32 %v1068_v60, %v964_v62  ;;  %v1036_v3 = vld [vmem:[%s1686_s5 + $0xac] sm:$0xf] }
  0x2a   :  { %588 = vmatpush.bf16.msrb.mxu1 %v995_v41  ;;  %614 = vmatpush.bf16.msrb.mxu3 %v999_v43  ;;  %s52_s14 = scalar_lea.vmem %s1685_s4, %s1453_s16  ;;  %v835_v2 = vor.u32 %v1038_v0, %v834_v63  ;;  %v836_v4 = vld [vmem:[%s1686_s5 + $0xb8] sm:$0xf0]  ;;  %v946_v5 = vld [vmem:[%s1686_s5 + $0x188] sm:$0xf]  ;;  %v1066_v7 = vld [vmem:[%s1686_s5 + $0x194] sm:$0xf0] }
  0x2b   :  { %575 = vmatpush.bf16.msrb.mxu0 %v867_v46  ;;  %s56_s30 = scalar_lea.vmem %s1685_s4, %s1455_s17  ;;  %v839_v6 = vor.u32 %v1036_v3, %v836_v4  ;;  %v1064_v8 = vld [vmem:[%s1686_s5 + $0x18c] sm:$0xf]  ;;  %v948_v9 = vld [vmem:[%s1686_s5 + $0x198] sm:$0xf0]  ;;  %v1519_v10 = vld [vmem:[%s52_s14] sm:$0x1]  ;;  %v947_v11 = vor.u32 %v1066_v7, %v946_v5 }
  0x2c   :  { %601 = vmatpush.bf16.msrb.mxu2 %v871_v47  ;;  %s1521_s0 = sld [smem:[#allocation5 + $0x5]]  ;;  %v951_v12 = vor.u32 %v1064_v8, %v948_v9  ;;  %v818_v13 = vld [vmem:[%s1686_s5 + $0x88] sm:$0xf]  ;;  %v1034_v14 = vld [vmem:[%s1686_s5 + $0x94] sm:$0xf0]  ;;  %v79_v19 = vrot.slane %v1519_v10, 7  ;;  %s48_s2 = scalar_lea.vmem %s1685_s4, %s1457_s18 }
  0x2d   :  { %v1032_v15 = vld [vmem:[%s1686_s5 + $0x8c] sm:$0xf]  ;;  %v1532_v16 = vld [vmem:[%s56_s30] sm:$0x1]  ;;  %s1534_s14 = sld [smem:[#allocation5 + $0x6]]  ;;  %v819_v17 = vor.u32 %v1034_v14, %v818_v13  ;;  %s60_s11 = scalar_lea.vmem %s1685_s4, %s1465_s22  ;;  %vm109_vm5 = vcmask 1045504  }
  0x2e   :  { %589 = vmatpush.bf16.msrb.mxu1 %v979_v50  ;;  %615 = vmatpush.bf16.msrb.mxu3 %v983_v51  ;;  %v820_v18 = vld [vmem:[%s1686_s5 + $0x98] sm:$0xf0]  ;;  %s1539_s24 = sld [smem:[#allocation5 + $0x7]]  ;;  %v930_v21 = vld [vmem:[%s1686_s5 + $0x168] sm:$0xf]  ;;  %v82_v24 = vrot.slane %v1532_v16, 6  ;;  %s64_s25 = scalar_lea.vmem %s1685_s4, %s1473_s27 }
  0x2f   :  { %576 = vmatpush.bf16.msrb.mxu0 %v851_v54  ;;  %v823_v20 = vor.u32 %v1032_v15, %v820_v18  ;;  %v1062_v22 = vld [vmem:[%s1686_s5 + $0x174] sm:$0xf0]  ;;  %v1060_v23 = vld [vmem:[%s1686_s5 + $0x16c] sm:$0xf]  ;;  %v932_v26 = vld [vmem:[%s1686_s5 + $0x178] sm:$0xf0] }
  0x30   :  { %602 = vmatpush.bf16.msrb.mxu2 %v855_v57  ;;  %v931_v25 = vor.u32 %v1062_v22, %v930_v21  ;;  %v802_v27 = vld [vmem:[%s1686_s5 + $0x68] sm:$0xf]  ;;  %v935_v28 = vor.u32 %v1060_v23, %v932_v26  ;;  %v1030_v29 = vld [vmem:[%s1686_s5 + $0x74] sm:$0xf0]  ;;  %v1028_v30 = vld [vmem:[%s1686_s5 + $0x6c] sm:$0xf] }
  0x31   :  { %v804_v31 = vld [vmem:[%s1686_s5 + $0x78] sm:$0xf0]  ;;  %v803_v32 = vor.u32 %v1030_v29, %v802_v27  ;;  %v914_v34 = vld [vmem:[%s1686_s5 + $0x148] sm:$0xf]  ;;  %v1058_v35 = vld [vmem:[%s1686_s5 + $0x154] sm:$0xf0] }
  0x32   :  { %590 = vmatpush.bf16.msrb.mxu1 %v963_v61  ;;  %616 = vmatpush.bf16.msrb.mxu3 %v967_v1  ;;  %v807_v33 = vor.u32 %v1028_v30, %v804_v31  ;;  %v1056_v36 = vld [vmem:[%s1686_s5 + $0x14c] sm:$0xf]  ;;  %v915_v37 = vor.u32 %v1058_v35, %v914_v34  ;;  %v916_v38 = vld [vmem:[%s1686_s5 + $0x158] sm:$0xf0]  ;;  %v786_v39 = vld [vmem:[%s1686_s5 + $0x48] sm:$0xf]  ;;  %s68_s19 = scalar_lea.vmem %s1685_s4, %s1521_s0 }
  0x33   :  { %577 = vmatpush.bf16.msrb.mxu0 %v835_v2  ;;  %v1026_v40 = vld [vmem:[%s1686_s5 + $0x54] sm:$0xf0]  ;;  %v49_v41 = vld [vmem:[%s48_s2] sm:$0x1]  ;;  %v919_v42 = vor.u32 %v1056_v36, %v916_v38  ;;  %v1024_v44 = vld [vmem:[%s1686_s5 + $0x4c] sm:$0xf]  ;;  %s72_s22 = scalar_lea.vmem %s1685_s4, %s1534_s14 }
  0x34   :  { %603 = vmatpush.bf16.msrb.mxu2 %v839_v6  ;;  %v787_v43 = vor.u32 %v1026_v40, %v786_v39  ;;  %v788_v45 = vld [vmem:[%s1686_s5 + $0x58] sm:$0xf0]  ;;  %v898_v46 = vld [vmem:[%s1686_s5 + $0x128] sm:$0xf]  ;;  %v1054_v48 = vld [vmem:[%s1686_s5 + $0x134] sm:$0xf0]  ;;  %v100_v1 = vsel %vm99_vm0, %v49_v41, %v79_v19  ;;  %s76_s21 = scalar_lea.vmem %s1685_s4, %s1539_s24 }
  0x35   :  { %v791_v47 = vor.u32 %v1024_v44, %v788_v45  ;;  %v1052_v49 = vld [vmem:[%s1686_s5 + $0x12c] sm:$0xf]  ;;  %v900_v50 = vld [vmem:[%s1686_s5 + $0x138] sm:$0xf0]  ;;  %v61_v51 = vld [vmem:[%s60_s11] sm:$0x1]  ;;  %v899_v52 = vor.u32 %v1054_v48, %v898_v46  ;;  %v102_v9 = vsel %vm101_vm1, %v100_v1, %v82_v24 }
  0x36   :  { %591 = vmatpush.bf16.msrb.mxu1 %v947_v11  ;;  %617 = vmatpush.bf16.msrb.mxu3 %v951_v12  ;;  %v770_v53 = vld [vmem:[%s1686_s5 + $0x28] sm:$0xf]  ;;  %v1022_v54 = vld [vmem:[%s1686_s5 + $0x34] sm:$0xf0]  ;;  %v1020_v55 = vld [vmem:[%s1686_s5 + $0x2c] sm:$0xf]  ;;  %v903_v56 = vor.u32 %v1052_v49, %v900_v50 }
  0x37   :  { %578 = vmatpush.bf16.msrb.mxu0 %v819_v17  ;;  %v772_v57 = vld [vmem:[%s1686_s5 + $0x38] sm:$0xf0]  ;;  %v882_v58 = vld [vmem:[%s1686_s5 + $0x108] sm:$0xf]  ;;  %v1050_v59 = vld [vmem:[%s1686_s5 + $0x114] sm:$0xf0]  ;;  %v771_v60 = vor.u32 %v1022_v54, %v770_v53 }
  0x38   :  { %604 = vmatpush.bf16.msrb.mxu2 %v823_v20  ;;  %v775_v61 = vor.u32 %v1020_v55, %v772_v57  ;;  %v1048_v62 = vld [vmem:[%s1686_s5 + $0x10c] sm:$0xf]  ;;  %v884_v63 = vld [vmem:[%s1686_s5 + $0x118] sm:$0xf0]  ;;  %v754_v0 = vld [vmem:[%s1686_s5 + $0x8] sm:$0xf]  ;;  %v883_v5 = vor.u32 %v1050_v59, %v882_v58 }
  0x39   :  { %v1018_v2 = vld [vmem:[%s1686_s5 + $0x14] sm:$0xf0]  ;;  %v1016_v3 = vld [vmem:[%s1686_s5 + $0xc] sm:$0xf]  ;;  %v756_v4 = vld [vmem:[%s1686_s5 + $0x18] sm:$0xf0]  ;;  %v887_v8 = vor.u32 %v1048_v62, %v884_v63 }
  0x3a   :  { %592 = vmatpush.bf16.msrb.mxu1 %v931_v25  ;;  %618 = vmatpush.bf16.msrb.mxu3 %v935_v28  ;;  %v65_v6 = vld [vmem:[%s64_s25] sm:$0x1]  ;;  %v85_v7 = vrot.slane %v61_v51, 5  ;;  %v755_v10 = vor.u32 %v1018_v2, %v754_v0  ;;  %v759_v11 = vor.u32 %v1016_v3, %v756_v4  ;;  %vm111_vm6 = vcmask 1046528   ;;  %s1169_s23 = smov [#allocation8]   ;;  %s715_s2 = sshll.u32 %s1689_s8, 4  ;;  %s716_s2 = int_to_ptr.hbm [resolvable:$true] %s715_s2 }
  0x3b   :  { %579 = vmatpush.bf16.msrb.mxu0 %v803_v32  ;;  %v69_v12 = vld [vmem:[%s68_s19] sm:$0x1]  ;;  %v88_v13 = vrot.slane %v65_v6, 4  ;;  %vm122_vm7 = vcmask 523264   ;;  %vm124_vm8 = vcmask 785408   ;;  %s713_s16 = sshll.u32 %s1169_s23, 4  ;;  %s714_s16 = int_to_ptr.vmem [resolvable:$true] %s713_s16 }
  0x3c   :  { %605 = vmatpush.bf16.msrb.mxu2 %v807_v33  ;;  %v104_v14 = vsel %vm103_vm2, %v102_v9, %v85_v7  ;;  %v73_v15 = vld [vmem:[%s72_s22] sm:$0x1]  ;;  %v91_v16 = vrot.slane %v69_v12, 3  ;;  %vm1000_vm9 = vmpackc.low %vm124_vm8, %vm124_vm8  ;;  %s704_s29 = sshll.u32 %s1688_s7, 4  ;;  %s705_s29 = int_to_ptr.hbm [resolvable:$true] %s704_s29 }
  0x3d   :  { %v106_v17 = vsel %vm105_vm3, %v104_v14, %v88_v13  ;;  %v77_v18 = vld [vmem:[%s76_s21] sm:$0x1]  ;;  %v94_v19 = vrot.slane %v73_v15, 2 }
  0x3e   :  { %593 = vmatpush.bf16.msrb.mxu1 %v915_v37  ;;  %619 = vmatpush.bf16.msrb.mxu3 %v919_v42  ;;  %v108_v20 = vsel %vm107_vm4, %v106_v17, %v91_v16  ;;  %v97_v22 = vrot.slane %v77_v18, 1  ;;  %v193_v30 = vld [vmem:[%s1687_s6] sm:$0xf] }
  0x3f   :  { %580 = vmatpush.bf16.msrb.mxu0 %v787_v43  ;;  %v110_v23 = vsel %vm109_vm5, %v108_v20, %v94_v19  ;;  %v195_v31 = vperm.slane %v193_v30, 0  ;;  %v196_v36 = vperm.slane %v193_v30, 1  ;;  %v197_v54 = vperm.slane %v193_v30, 2 }
  0x40   :  { %606 = vmatpush.bf16.msrb.mxu2 %v791_v47  ;;  %v112_v24 = vsel %vm111_vm6, %v110_v23, %v97_v22  ;;  %v42_v22 = vld [vmem:[%s1684_s3] sm:$0xff]  ;;  %s1170_s3 = smov [#allocation6]  }
  0x41   :  { %s702_s8 = sshll.u32 %s1170_s3, 4  ;;  %s703_s8 = int_to_ptr.vmem [resolvable:$true] %s702_s8 }
  0x42   :  { %594 = vmatpush.bf16.msrb.mxu1 %v899_v52  ;;  %620 = vmatpush.bf16.msrb.mxu3 %v903_v56  ;;  %v198_v52 = vperm.slane %v193_v30, 3 }
  0x43   :  { %581 = vmatpush.bf16.msrb.mxu0 %v771_v60 }
  0x44   :  { %607 = vmatpush.bf16.msrb.mxu2 %v775_v61 }
  0x46   :  { %595 = vmatpush.bf16.msrb.mxu1 %v883_v5  ;;  %621 = vmatpush.bf16.msrb.mxu3 %v887_v8 }
  0x47   :  { %582 = vmatpush.bf16.msrb.mxu0 %v755_v10 }
  0x48   :  { %608 = vmatpush.bf16.msrb.mxu2 %v759_v11 }
  0x79   :  { %v116_v21 = vpop.permute.xlu0 %115 }
  0x7a   :  { %v123_v25 = vsel %vm122_vm7, %v112_v24, %v116_v21 }
  0x81   :  { %v120_v26 = vpop.permute.xlu0 %119 }
  0x82   :  { %v125_v27 = vsel %vm124_vm8, %v123_v25, %v120_v26  ;;  %v1001_v28 = vpack.c.bf16 %v120_v26, %v120_v26 }
  0x83   :  { %v127_v29 = vpack.c.bf16 %v125_v27, %v125_v27 }
  0x84   :  { %1002 = vmatmul.msk.bf16.vlgmr.msra.gmra.mxu1 %vm1000_vm9, %v1001_v28  ;;  %1005 = vmatmul.msk.bf16.vlgmr.msra.gmra.mxu3 %vm1000_vm9, %v1001_v28 }
  0x85   :  { %531 = vmatmul.bf16.vlgmr.msra.gmra.mxu0 %v127_v29  ;;  %557 = vmatmul.bf16.vlgmr.msra.gmra.mxu2 %v127_v29 }
  0x94   :  { %1008 = vmatmul.msk.bf16.vlgmr.msrb.gmra.mxu1 %vm1000_vm9, %v1001_v28  ;;  %1011 = vmatmul.msk.bf16.vlgmr.msrb.gmra.mxu3 %vm1000_vm9, %v1001_v28 }
  0x95   :  { %583 = vmatmul.bf16.vlgmr.msrb.gmra.mxu0 %v127_v29  ;;  %609 = vmatmul.bf16.vlgmr.msrb.gmra.mxu2 %v127_v29 }
 0x101   :  { %v545_v32 = vpop.f32.mrf.mxu1 }
 0x102   :  { %v532_v33 = vpop.f32.mrf.mxu0 }
 0x103   :  { %v533_v34 = vadd.f32 %v532_v33, %v195_v31 }
 0x105   :  { %v546_v35 = vadd.f32 %v545_v32, %v533_v34 }
 0x107   :  { %v1012_v37 = vmul.f32 -1.442695, %v546_v35  ;;  %v571_v38 = vpop.f32.mrf.mxu3 }
 0x108   :  { %v558_v39 = vpop.f32.mrf.mxu2 }
 0x109   :  { %1084 = vpow2.f32 %v1012_v37  ;;  %v559_v40 = vadd.f32 %v558_v39, %v196_v36  ;;  %v547_v41 = vpop.f32.mrf.mxu1 }
 0x10a   :  { %v534_v42 = vpop.f32.mrf.mxu0 }
 0x10b   :  { %v572_v43 = vadd.f32 %v571_v38, %v559_v40 }
 0x10d   :  { %v1013_v44 = vmul.f32 -1.442695, %v572_v43 }
 0x10f   :  { %v1085_v45 = vpop.eup %1084  ;;  %1086 = vpow2.f32 %v1013_v44  ;;  %v573_v46 = vpop.f32.mrf.mxu3 }
 0x110   :  { %v630_v47 = vadd.f32 1.0, %v1085_v45  ;;  %v560_v48 = vpop.f32.mrf.mxu2 }
 0x111   :  { %v597_v49 = vpop.f32.mrf.mxu1 }
 0x112   :  { %1088 = vrcp.f32 %v630_v47  ;;  %v584_v50 = vpop.f32.mrf.mxu0  ;;  %v642_v8 = vand.u32 2147483648, %v630_v47  ;;  %vm636_vm11 = vweird.f32 %v630_v47  ;;  %v640_v11 = vand.u32 2147483647, %v630_v47 }
 0x113   :  { %v585_v61 = vadd.f32 %v584_v50, %v197_v54 }
 0x114   :  { %v643_v16 = vor.u32 1.1754944e-38, %v642_v8  ;;  %vm641_vm15 = vcmp.eq.f32.partialorder %v640_v11, 8.507059e+37 }
 0x115   :  { %v1087_v51 = vpop.eup %1086  ;;  %v598_v4 = vadd.f32 %v597_v49, %v585_v61 }
 0x116   :  { %v649_v53 = vadd.f32 1.0, %v1087_v51 }
 0x117   :  { %v623_v55 = vpop.f32.mrf.mxu3 }
 0x118   :  { %v1089_v56 = vpop.eup %1088  ;;  %1090 = vrcp.f32 %v649_v53  ;;  %v610_v57 = vpop.f32.mrf.mxu2  ;;  %v661_v12 = vand.u32 2147483648, %v649_v53  ;;  %v659_v15 = vand.u32 2147483647, %v649_v53  ;;  %vm655_vm14 = vweird.f32 %v649_v53 }
 0x119   :  { %v632_v58 = vmul.f32 %v1089_v56, %v630_v47  ;;  %v611_v59 = vadd.f32 %v610_v57, %v198_v52  ;;  %v599_v60 = vpop.f32.mrf.mxu1  ;;  %vm637_vm10 = vweird.f32 %v1089_v56 }
 0x11a   :  { %v586_v62 = vpop.f32.mrf.mxu0  ;;  %vm638_vm12 = vmor %vm636_vm11, %vm637_vm10  ;;  %v662_v19 = vor.u32 1.1754944e-38, %v661_v12  ;;  %vm660_vm1 = vcmp.eq.f32.partialorder %v659_v15, 8.507059e+37 }
 0x11b   :  { %v633_v63 = vsub.f32 1.0, %v632_v58  ;;  %v624_v0 = vadd.f32 %v623_v55, %v611_v59 }
 0x11d   :  { %v634_v1 = vmul.f32 %v1089_v56, %v633_v63  ;;  %v1014_v2 = vmul.f32 -1.442695, %v624_v0 }
 0x11e   :  { %v1091_v3 = vpop.eup %1090 }
 0x11f   :  { %v651_v5 = vmul.f32 %v1091_v3, %v649_v53  ;;  %v635_v6 = vadd.f32 %v1089_v56, %v634_v1  ;;  %1092 = vpow2.f32 %v1014_v2  ;;  %v625_v7 = vpop.f32.mrf.mxu3  ;;  %vm656_vm13 = vweird.f32 %v1091_v3 }
 0x120   :  { %v612_v9 = vpop.f32.mrf.mxu2  ;;  %1094 = vtanh.f32 %v598_v4  ;;  %vm657_vm0 = vmor %vm655_vm14, %vm656_vm13 }
 0x121   :  { %v652_v10 = vsub.f32 1.0, %v651_v5  ;;  %v639_v14 = vsel %vm638_vm12, %v1089_v56, %v635_v6 }
 0x122   :  { %v644_v20 = vsel %vm641_vm15, %v643_v16, %v639_v14 }
 0x123   :  { %v653_v13 = vmul.f32 %v1091_v3, %v652_v10 }
 0x125   :  { %v1093_v17 = vpop.eup %1092  ;;  %v654_v18 = vadd.f32 %v1091_v3, %v653_v13 }
 0x126   :  { %v669_v21 = vadd.f32 1.0, %v1093_v17  ;;  %v1095_v24 = vpop.eup %1094 }
 0x127   :  { %v658_v23 = vsel %vm657_vm0, %v1091_v3, %v654_v18  ;;  %v686_v26 = vmul.f32 %v1095_v24, %v644_v20 }
 0x128   :  { %1096 = vrcp.f32 %v669_v21  ;;  %v663_v25 = vsel %vm660_vm1, %v662_v19, %v658_v23  ;;  %v681_v32 = vand.u32 2147483648, %v669_v21  ;;  %v679_v34 = vand.u32 2147483647, %v669_v21 }
 0x129   :  { %v685_v27 = vmul.f32 %v663_v25, %v42_v22  ;;  %vm675_vm3 = vweird.f32 %v669_v21 }
 0x12a   :  { %v682_v36 = vor.u32 1.1754944e-38, %v681_v32  ;;  %vm680_vm5 = vcmp.eq.f32.partialorder %v679_v34, 8.507059e+37 }
 0x12b   :  { %v687_v28 = vadd.f32 %v686_v26, %v685_v27 }
 0x12d   :  { %696 = vst [vmem:[#allocation8] sm:$0xff] %v687_v28  ;;  %1098 = vtanh.f32 %v687_v28 }
 0x12e   :  { %v1097_v29 = vpop.eup %1096  ;;  %718 = dma.vmem_to_hbm [thread:$0]  %s714_s16, 128, %s716_s2, [#allocation9]  }
 0x12f   :  { %v671_v30 = vmul.f32 %v1097_v29, %v669_v21  ;;  %vm676_vm2 = vweird.f32 %v1097_v29 }
 0x130   :  { %vm677_vm4 = vmor %vm675_vm3, %vm676_vm2 }
 0x131   :  { %v672_v31 = vsub.f32 1.0, %v671_v30 }
 0x133   :  { %v673_v33 = vmul.f32 %v1097_v29, %v672_v31  ;;  %v1099_v38 = vpop.eup %1098 }
 0x135   :  { %v674_v35 = vadd.f32 %v1097_v29, %v673_v33 }
 0x137   :  { %v678_v37 = vsel %vm677_vm4, %v1097_v29, %v674_v35 }
 0x138   :  { %v683_v39 = vsel %vm680_vm5, %v682_v36, %v678_v37 }
 0x139   :  { %v689_v40 = vmul.f32 %v1099_v38, %v683_v39 }
 0x13b   :  { %695 = vst [vmem:[#allocation6] sm:$0xff] %v689_v40 }
 0x13c   :  { %707 = dma.vmem_to_hbm [thread:$0]  %s703_s8, 128, %s705_s29, [#allocation7]  }
 0x13d   :  { %1162 = dma.done.wait [#allocation7], 128  }
 0x13e   :  { %1163 = vsyncadd [#allocation7], 4294967168 }
 0x13f   :  { %1164 = dma.done.wait [#allocation9], 128  }
 0x140   :  { %1165 = vsyncadd [#allocation9], 4294967168 }
 0x141   :  { %727 = vsyncpa [#allocation7], 1 }
 0x142   :  { %728 = vsyncpa [#allocation9], 1 }

</bundles_post_ra>
